<compile_context>
chip_gen: v7x
topology: tpu7x:2x2x1
jax: 0.10.0
libtpu: 0.0.40
codegen_flags: <defaults>
</compile_context>

<pallas_src>
import jax
import jax.numpy as jnp
from jax.experimental import pallas as pl
from jax.experimental.pallas import tpu as pltpu

_LANE = 128
_MXU_COL_CHUNK = 2048     # spatial columns per in-kernel dot (bounds f32 intermediates)
_VPU_ROW_CHUNK = 64       # (rows, 128) rows per in-kernel VPU accumulation chunk


def _vmem_capacity_bytes():
    """Per-TensorCore VMEM capacity (generation-aware), with a safe fallback."""
    try:
        cap = int(pltpu.get_tpu_info().vmem_capacity_bytes)
        if cap > 0:
            return cap
    except Exception:
        pass
    return 64 * 1024 * 1024   # v7x per-TC physical VMEM: safe lower bound everywhere


def _pick_tiles(N, S, C_in, C_out, tile_budget_bytes, *, lane_quantum,
                max_ts=64 * 1024, min_steps=8,
                target_step_bytes=2 * 1024 * 1024, max_batch_block=8):
    """Choose (Nb, ts): batch block and lane-dense spatial tile (in elements).

    Priorities:
      1. Double-buffered x + out tiles (f32) must fit `tile_budget_bytes`.
      2. Each grid step should move ~MiBs of HBM traffic (>> 0.35 us step cost):
         large ts, and fold batch images together (Nb > 1) when S is small.
      3. Keep >= `min_steps` total grid steps when there is enough work so both
         v7x TensorCores get a share of the "parallel" grid.
    """
    row_bytes = (C_in + C_out) * 4                       # f32 bytes per lane column per image

    # --- spatial tile: as large as the VMEM budget allows ---
    cap = (tile_budget_bytes // (2 * row_bytes)) // lane_quantum * lane_quantum
    cap = max(lane_quantum, cap)
    ts_cap = min(max_ts, cap)
    if S <= ts_cap:
        ts = S                                           # full extent: always a legal block dim
    else:
        # Prefer a quantum-multiple that divides S (no ragged tail); else the cap.
        ts = next((c for c in range(ts_cap, lane_quantum - 1, -lane_quantum)
                   if S % c == 0), ts_cap)

    # --- batch blocking: fold images while per-step traffic is still tiny ---
    Nb = 1
    if ts == S and N > 1:
        for d in range(min(N, max_batch_block), 1, -1):
            if N % d:
                continue
            if 2 * d * S * row_bytes > tile_budget_bytes:
                continue
            if d * S * row_bytes <= target_step_bytes:
                Nb = d
                break

    # --- megacore: keep >= min_steps steps when there is enough data ---
    steps = (N // Nb) * pl.cdiv(S, ts)
    if steps < min_steps and ts == S:
        # Never shrink a tile below ~256 KiB of traffic (that would reintroduce
        # the per-step-overhead problem this policy exists to fix).
        floor_cols = max(lane_quantum,
                         ((256 * 1024) // (Nb * row_bytes))
                         // lane_quantum * lane_quantum)
        want_sp = pl.cdiv(min_steps, N // Nb)
        ts_split = pl.cdiv(pl.cdiv(S, want_sp), lane_quantum) * lane_quantum
        if floor_cols <= ts_split < S:
            ts = ts_split
    return Nb, ts


def _outconv_mxu_kernel(x_ref, w_ref, b_ref, o_ref):
    # x_ref: (Nb, C_in, ts)   w_ref: (C_out, C_in)   b_ref: (C_out, 1)
    # o_ref: (Nb, C_out, ts)
    nb, _, ts = x_ref.shape
    w = w_ref[...]
    b = b_ref[...]

    def chunk(i, c0, cc):
        cs = pl.ds(c0, cc)
        acc = jnp.dot(w, x_ref[i, :, cs], preferred_element_type=jnp.float32)
        o_ref[i, :, cs] = (acc + b).astype(o_ref.dtype)

    # Nb and the chunk count are small static constants -> full static unroll.
    for i in range(nb):
        for c in range(ts // _MXU_COL_CHUNK):
            chunk(i, c * _MXU_COL_CHUNK, _MXU_COL_CHUNK)
        if ts % _MXU_COL_CHUNK:
            chunk(i, (ts // _MXU_COL_CHUNK) * _MXU_COL_CHUNK, ts % _MXU_COL_CHUNK)


def _outconv_vpu_kernel(x_ref, w_ref, b_ref, o_ref):
    # x_ref: (Nb, C_in, tr, 128)            o_ref: (Nb, C_out, tr, 128)
    # w_ref: (C_out, C_in, 1, 128)  lane-replicated scalars (broadcast on sublanes)
    # b_ref: (C_out, 1, 128)
    nb, c_in, tr, _ = x_ref.shape
    c_out = o_ref.shape[1]

    def chunk(i, r0, rc):
        rs = pl.ds(r0, rc)
        for co in range(c_out):
            acc = x_ref[i, 0, rs, :] * w_ref[co, 0]
            for ci in range(1, c_in):
                acc = acc + x_ref[i, ci, rs, :] * w_ref[co, ci]
            o_ref[i, co, rs, :] = (acc + b_ref[co]).astype(o_ref.dtype)

    # Row-chunking keeps the accumulators in a handful of vregs (no spilling),
    # while the grid-level tile stays wide enough to amortize step overhead.
    for i in range(nb):
        for c in range(tr // _VPU_ROW_CHUNK):
            chunk(i, c * _VPU_ROW_CHUNK, _VPU_ROW_CHUNK)
        if tr % _VPU_ROW_CHUNK:
            chunk(i, (tr // _VPU_ROW_CHUNK) * _VPU_ROW_CHUNK, tr % _VPU_ROW_CHUNK)


def outconv_forward(x_nchw, weight, bias):
    """1x1 conv forward.

    x_nchw : (N, C_in, H, W)   float32
    weight : (C_out, C_in)     float32  (squeezed from (C_out, C_in, 1, 1))
    bias   : (C_out,)          float32
    returns: (N, C_out, H, W)  float32
    """
    N, C_in, H, W = x_nchw.shape
    C_out = weight.shape[0]
    S = H * W

    # Generation-aware VMEM provisioning: ~75% of physical capacity as the
    # scoped limit (96 MiB on v5e/v6e, 48 MiB on v7x); tile budget leaves room
    # for the (double-buffered) weight/bias blocks plus compiler scratch.
    vmem_cap = _vmem_capacity_bytes()
    vmem_limit = int(vmem_cap * 3 // 4)
    w_bytes = 2 * (C_out * C_in * _LANE + C_out * _LANE + C_out * C_in + C_out) * 4
    tile_budget = max(2 * 1024 * 1024, vmem_limit - w_bytes - 4 * 1024 * 1024)

    use_vpu = (C_in <= 8) and (C_out <= 8) and (S % _LANE == 0)
    lane_quantum = 8 * _LANE if use_vpu else _LANE    # VPU path wants sublane-dense row tiles
    Nb, ts = _pick_tiles(N, S, C_in, C_out, tile_budget, lane_quantum=lane_quantum)
    grid = (N // Nb, pl.cdiv(S, ts))

    cost = pl.CostEstimate(
        flops=2 * N * S * C_in * C_out,
        transcendentals=0,
        bytes_accessed=4 * (N * S * (C_in + C_out) + C_out * C_in + C_out))
    cparams = pltpu.CompilerParams(
        dimension_semantics=("parallel", "parallel"),
        vmem_limit_bytes=vmem_limit)

    if use_vpu:
        rows = S // _LANE
        tr = rows if ts == S else ts // _LANE
        x_in = x_nchw.reshape(N, C_in, rows, _LANE)            # free, contiguous reshape
        w_bcast = jnp.broadcast_to(weight[:, :, None, None], (C_out, C_in, 1, _LANE))
        b_bcast = jnp.broadcast_to(bias[:, None, None], (C_out, 1, _LANE))
        out = pl.pallas_call(
            _outconv_vpu_kernel,
            out_shape=jax.ShapeDtypeStruct((N, C_out, rows, _LANE), x_nchw.dtype),
            grid_spec=pltpu.PrefetchScalarGridSpec(
                num_scalar_prefetch=0,
                grid=grid,
                in_specs=[
                    pl.BlockSpec((Nb, C_in, tr, _LANE), lambda n, r: (n, 0, r, 0)),
                    # Weight / bias: constant block index -> VMEM-resident.
                    pl.BlockSpec((C_out, C_in, 1, _LANE), lambda n, r: (0, 0, 0, 0)),
                    pl.BlockSpec((C_out, 1, _LANE), lambda n, r: (0, 0, 0)),
                ],
                out_specs=pl.BlockSpec((Nb, C_out, tr, _LANE), lambda n, r: (n, 0, r, 0)),
            ),
            compiler_params=cparams,
            cost_estimate=cost,
        )(x_in, w_bcast, b_bcast)
        return out.reshape(N, C_out, H, W)                     # free reshape back to NCHW

    x_rows = x_nchw.reshape(N, C_in, S)                        # free, contiguous reshape
    b_col = bias.reshape(C_out, 1)
    out = pl.pallas_call(
        _outconv_mxu_kernel,
        out_shape=jax.ShapeDtypeStruct((N, C_out, S), x_nchw.dtype),
        grid_spec=pltpu.PrefetchScalarGridSpec(
            num_scalar_prefetch=0,
            grid=grid,
            in_specs=[
                # Activation tile: channel-major, large lane-dense spatial axis.
                pl.BlockSpec((Nb, C_in, ts), lambda n, s: (n, 0, s)),
                # Weight / bias: constant block index -> VMEM-resident.
                pl.BlockSpec((C_out, C_in), lambda n, s: (0, 0)),
                pl.BlockSpec((C_out, 1), lambda n, s: (0, 0)),
            ],
            out_specs=pl.BlockSpec((Nb, C_out, ts), lambda n, s: (n, 0, s)),
        ),
        compiler_params=cparams,
        cost_estimate=cost,
    )(x_rows, weight, b_col)
    return out.reshape(N, C_out, H, W)                         # free reshape back to NCHW


def make_params(key, in_channels, out_channels):
    # Deterministic init mimicking nn.Conv2d default (uniform in +/- 1/sqrt(fan_in)).
    kw, kb = jax.random.split(key)
    fan_in = in_channels * 1 * 1
    bound = 1.0 / jnp.sqrt(fan_in)
    weight = jax.random.uniform(
        kw, (out_channels, in_channels), jnp.float32, -bound, bound)
    bias = jax.random.uniform(kb, (out_channels,), jnp.float32, -bound, bound)
    return weight, bias


if __name__ == "__main__":
    key = jax.random.PRNGKey(0)
    kx1, kp1, kx2, kp2 = jax.random.split(key, 4)

    # Case 1 (spec shapes): tiny channels -> sublane-dense VPU path.
    N, C_in, H, W, C_out = 2, 4, 16, 16, 3
    x = jax.random.normal(kx1, (N, C_in, H, W), dtype=jnp.float32)
    weight, bias = make_params(kp1, C_in, C_out)
    y = jax.block_until_ready(outconv_forward(x, weight, bias))
    y_ref = jnp.einsum("nchw,oc->nohw", x, weight) + bias[None, :, None, None]
    assert y.shape == (N, C_out, H, W)
    assert jnp.allclose(y, y_ref, atol=1e-5, rtol=1e-5)

    # Case 2: larger C_in and non-128-multiple spatial extent -> MXU path.
    N2, C2_in, H2, W2, C2_out = 2, 32, 8, 8, 3
    x2 = jax.random.normal(kx2, (N2, C2_in, H2, W2), dtype=jnp.float32)
    w2, b2 = make_params(kp2, C2_in, C2_out)
    y2 = jax.block_until_ready(outconv_forward(x2, w2, b2))
    y2_ref = jnp.einsum("nchw,oc->nohw", x2, w2) + b2[None, :, None, None]
    assert y2.shape == (N2, C2_out, H2, W2)
    assert jnp.allclose(y2, y2_ref, atol=1e-4, rtol=1e-4)

    print("KERNEL_OK")
</pallas_src>

<mosaic_0001>
module attributes {stable_mosaic.version = 11 : i64} {
  func.func @_outconv_vpu_kernel(%arg0: i32, %arg1: i32, %arg2: memref<2x4x2x128xf32, #tpu.memory_space<vmem>>, %arg3: memref<3x4x1x128xf32, #tpu.memory_space<vmem>>, %arg4: memref<3x1x128xf32, #tpu.memory_space<vmem>>, %arg5: memref<2x3x2x128xf32, #tpu.memory_space<vmem>>) attributes {dimension_semantics = [#tpu.dimension_semantics<parallel>, #tpu.dimension_semantics<parallel>], iteration_bounds = array<i64: 1, 1>, scalar_prefetch = 0 : i64, scratch_operands = 0 : i64, tpu.core_type = #tpu.core_type<tc>, window_params = [{transform_indices = @transform_0, window_bounds = array<i64: 2, 4, 2, 128>}, {pipeline_mode = #tpu.pipeline_mode<synchronous>, transform_indices = @transform_1, window_bounds = array<i64: 3, 4, 1, 128>}, {pipeline_mode = #tpu.pipeline_mode<synchronous>, transform_indices = @transform_2, window_bounds = array<i64: 3, 1, 128>}, {transform_indices = @transform_3, window_bounds = array<i64: 2, 3, 2, 128>}]} {
    %c0 = arith.constant 0 : index
    %c0_0 = arith.constant 0 : index
    %c0_1 = arith.constant 0 : index
    %c0_2 = arith.constant 0 : index
    %0 = vector.load %arg2[%c0, %c0_0, %c0_1, %c0_2] : memref<2x4x2x128xf32, #tpu.memory_space<vmem>>, vector<1x1x2x128xf32>
    %1 = vector.shape_cast %0 : vector<1x1x2x128xf32> to vector<2x128xf32>
    %c0_3 = arith.constant 0 : index
    %c0_4 = arith.constant 0 : index
    %c0_5 = arith.constant 0 : index
    %c0_6 = arith.constant 0 : index
    %2 = vector.load %arg3[%c0_3, %c0_4, %c0_5, %c0_6] : memref<3x4x1x128xf32, #tpu.memory_space<vmem>>, vector<1x1x1x128xf32>
    %3 = vector.shape_cast %2 : vector<1x1x1x128xf32> to vector<1x128xf32>
    %4 = vector.broadcast %3 : vector<1x128xf32> to vector<2x128xf32>
    %5 = arith.mulf %1, %4 : vector<2x128xf32>
    %c0_7 = arith.constant 0 : index
    %c1 = arith.constant 1 : index
    %c0_8 = arith.constant 0 : index
    %c0_9 = arith.constant 0 : index
    %6 = vector.load %arg2[%c0_7, %c1, %c0_8, %c0_9] : memref<2x4x2x128xf32, #tpu.memory_space<vmem>>, vector<1x1x2x128xf32>
    %7 = vector.shape_cast %6 : vector<1x1x2x128xf32> to vector<2x128xf32>
    %c0_10 = arith.constant 0 : index
    %c1_11 = arith.constant 1 : index
    %c0_12 = arith.constant 0 : index
    %c0_13 = arith.constant 0 : index
    %8 = vector.load %arg3[%c0_10, %c1_11, %c0_12, %c0_13] : memref<3x4x1x128xf32, #tpu.memory_space<vmem>>, vector<1x1x1x128xf32>
    %9 = vector.shape_cast %8 : vector<1x1x1x128xf32> to vector<1x128xf32>
    %10 = vector.broadcast %9 : vector<1x128xf32> to vector<2x128xf32>
    %11 = arith.mulf %7, %10 : vector<2x128xf32>
    %12 = arith.addf %5, %11 : vector<2x128xf32>
    %c0_14 = arith.constant 0 : index
    %c2 = arith.constant 2 : index
    %c0_15 = arith.constant 0 : index
    %c0_16 = arith.constant 0 : index
    %13 = vector.load %arg2[%c0_14, %c2, %c0_15, %c0_16] : memref<2x4x2x128xf32, #tpu.memory_space<vmem>>, vector<1x1x2x128xf32>
    %14 = vector.shape_cast %13 : vector<1x1x2x128xf32> to vector<2x128xf32>
    %c0_17 = arith.constant 0 : index
    %c2_18 = arith.constant 2 : index
    %c0_19 = arith.constant 0 : index
    %c0_20 = arith.constant 0 : index
    %15 = vector.load %arg3[%c0_17, %c2_18, %c0_19, %c0_20] : memref<3x4x1x128xf32, #tpu.memory_space<vmem>>, vector<1x1x1x128xf32>
    %16 = vector.shape_cast %15 : vector<1x1x1x128xf32> to vector<1x128xf32>
    %17 = vector.broadcast %16 : vector<1x128xf32> to vector<2x128xf32>
    %18 = arith.mulf %14, %17 : vector<2x128xf32>
    %19 = arith.addf %12, %18 : vector<2x128xf32>
    %c0_21 = arith.constant 0 : index
    %c3 = arith.constant 3 : index
    %c0_22 = arith.constant 0 : index
    %c0_23 = arith.constant 0 : index
    %20 = vector.load %arg2[%c0_21, %c3, %c0_22, %c0_23] : memref<2x4x2x128xf32, #tpu.memory_space<vmem>>, vector<1x1x2x128xf32>
    %21 = vector.shape_cast %20 : vector<1x1x2x128xf32> to vector<2x128xf32>
    %c0_24 = arith.constant 0 : index
    %c3_25 = arith.constant 3 : index
    %c0_26 = arith.constant 0 : index
    %c0_27 = arith.constant 0 : index
    %22 = vector.load %arg3[%c0_24, %c3_25, %c0_26, %c0_27] : memref<3x4x1x128xf32, #tpu.memory_space<vmem>>, vector<1x1x1x128xf32>
    %23 = vector.shape_cast %22 : vector<1x1x1x128xf32> to vector<1x128xf32>
    %24 = vector.broadcast %23 : vector<1x128xf32> to vector<2x128xf32>
    %25 = arith.mulf %21, %24 : vector<2x128xf32>
    %26 = arith.addf %19, %25 : vector<2x128xf32>
    %c0_28 = arith.constant 0 : index
    %c0_29 = arith.constant 0 : index
    %c0_30 = arith.constant 0 : index
    %27 = vector.load %arg4[%c0_28, %c0_29, %c0_30] : memref<3x1x128xf32, #tpu.memory_space<vmem>>, vector<1x1x128xf32>
    %28 = vector.shape_cast %27 : vector<1x1x128xf32> to vector<1x128xf32>
    %29 = vector.broadcast %28 : vector<1x128xf32> to vector<2x128xf32>
    %30 = arith.addf %26, %29 : vector<2x128xf32>
    %c0_31 = arith.constant 0 : index
    %c0_32 = arith.constant 0 : index
    %c0_33 = arith.constant 0 : index
    %c0_34 = arith.constant 0 : index
    %31 = vector.load %arg5[%c0_31, %c0_32, %c0_33, %c0_34] : memref<2x3x2x128xf32, #tpu.memory_space<vmem>>, vector<1x1x2x128xf32>
    %32 = vector.shape_cast %31 : vector<1x1x2x128xf32> to vector<2x128xf32>
    %33 = vector.shape_cast %30 : vector<2x128xf32> to vector<1x1x2x128xf32>
    tpu.vector_store %arg5[%c0_31, %c0_32, %c0_33, %c0_34], %33 {strides = array<i32>} : memref<2x3x2x128xf32, #tpu.memory_space<vmem>>, vector<1x1x2x128xf32>,
    %c0_35 = arith.constant 0 : index
    %c0_36 = arith.constant 0 : index
    %c0_37 = arith.constant 0 : index
    %c0_38 = arith.constant 0 : index
    %34 = vector.load %arg2[%c0_35, %c0_36, %c0_37, %c0_38] : memref<2x4x2x128xf32, #tpu.memory_space<vmem>>, vector<1x1x2x128xf32>
    %35 = vector.shape_cast %34 : vector<1x1x2x128xf32> to vector<2x128xf32>
    %c1_39 = arith.constant 1 : index
    %c0_40 = arith.constant 0 : index
    %c0_41 = arith.constant 0 : index
    %c0_42 = arith.constant 0 : index
    %36 = vector.load %arg3[%c1_39, %c0_40, %c0_41, %c0_42] : memref<3x4x1x128xf32, #tpu.memory_space<vmem>>, vector<1x1x1x128xf32>
    %37 = vector.shape_cast %36 : vector<1x1x1x128xf32> to vector<1x128xf32>
    %38 = vector.broadcast %37 : vector<1x128xf32> to vector<2x128xf32>
    %39 = arith.mulf %35, %38 : vector<2x128xf32>
    %c0_43 = arith.constant 0 : index
    %c1_44 = arith.constant 1 : index
    %c0_45 = arith.constant 0 : index
    %c0_46 = arith.constant 0 : index
    %40 = vector.load %arg2[%c0_43, %c1_44, %c0_45, %c0_46] : memref<2x4x2x128xf32, #tpu.memory_space<vmem>>, vector<1x1x2x128xf32>
    %41 = vector.shape_cast %40 : vector<1x1x2x128xf32> to vector<2x128xf32>
    %c1_47 = arith.constant 1 : index
    %c1_48 = arith.constant 1 : index
    %c0_49 = arith.constant 0 : index
    %c0_50 = arith.constant 0 : index
    %42 = vector.load %arg3[%c1_47, %c1_48, %c0_49, %c0_50] : memref<3x4x1x128xf32, #tpu.memory_space<vmem>>, vector<1x1x1x128xf32>
    %43 = vector.shape_cast %42 : vector<1x1x1x128xf32> to vector<1x128xf32>
    %44 = vector.broadcast %43 : vector<1x128xf32> to vector<2x128xf32>
    %45 = arith.mulf %41, %44 : vector<2x128xf32>
    %46 = arith.addf %39, %45 : vector<2x128xf32>
    %c0_51 = arith.constant 0 : index
    %c2_52 = arith.constant 2 : index
    %c0_53 = arith.constant 0 : index
    %c0_54 = arith.constant 0 : index
    %47 = vector.load %arg2[%c0_51, %c2_52, %c0_53, %c0_54] : memref<2x4x2x128xf32, #tpu.memory_space<vmem>>, vector<1x1x2x128xf32>
    %48 = vector.shape_cast %47 : vector<1x1x2x128xf32> to vector<2x128xf32>
    %c1_55 = arith.constant 1 : index
    %c2_56 = arith.constant 2 : index
    %c0_57 = arith.constant 0 : index
    %c0_58 = arith.constant 0 : index
    %49 = vector.load %arg3[%c1_55, %c2_56, %c0_57, %c0_58] : memref<3x4x1x128xf32, #tpu.memory_space<vmem>>, vector<1x1x1x128xf32>
    %50 = vector.shape_cast %49 : vector<1x1x1x128xf32> to vector<1x128xf32>
    %51 = vector.broadcast %50 : vector<1x128xf32> to vector<2x128xf32>
    %52 = arith.mulf %48, %51 : vector<2x128xf32>
    %53 = arith.addf %46, %52 : vector<2x128xf32>
    %c0_59 = arith.constant 0 : index
    %c3_60 = arith.constant 3 : index
    %c0_61 = arith.constant 0 : index
    %c0_62 = arith.constant 0 : index
    %54 = vector.load %arg2[%c0_59, %c3_60, %c0_61, %c0_62] : memref<2x4x2x128xf32, #tpu.memory_space<vmem>>, vector<1x1x2x128xf32>
    %55 = vector.shape_cast %54 : vector<1x1x2x128xf32> to vector<2x128xf32>
    %c1_63 = arith.constant 1 : index
    %c3_64 = arith.constant 3 : index
    %c0_65 = arith.constant 0 : index
    %c0_66 = arith.constant 0 : index
    %56 = vector.load %arg3[%c1_63, %c3_64, %c0_65, %c0_66] : memref<3x4x1x128xf32, #tpu.memory_space<vmem>>, vector<1x1x1x128xf32>
    %57 = vector.shape_cast %56 : vector<1x1x1x128xf32> to vector<1x128xf32>
    %58 = vector.broadcast %57 : vector<1x128xf32> to vector<2x128xf32>
    %59 = arith.mulf %55, %58 : vector<2x128xf32>
    %60 = arith.addf %53, %59 : vector<2x128xf32>
    %c1_67 = arith.constant 1 : index
    %c0_68 = arith.constant 0 : index
    %c0_69 = arith.constant 0 : index
    %61 = vector.load %arg4[%c1_67, %c0_68, %c0_69] : memref<3x1x128xf32, #tpu.memory_space<vmem>>, vector<1x1x128xf32>
    %62 = vector.shape_cast %61 : vector<1x1x128xf32> to vector<1x128xf32>
    %63 = vector.broadcast %62 : vector<1x128xf32> to vector<2x128xf32>
    %64 = arith.addf %60, %63 : vector<2x128xf32>
    %c0_70 = arith.constant 0 : index
    %c1_71 = arith.constant 1 : index
    %c0_72 = arith.constant 0 : index
    %c0_73 = arith.constant 0 : index
    %65 = vector.load %arg5[%c0_70, %c1_71, %c0_72, %c0_73] : memref<2x3x2x128xf32, #tpu.memory_space<vmem>>, vector<1x1x2x128xf32>
    %66 = vector.shape_cast %65 : vector<1x1x2x128xf32> to vector<2x128xf32>
    %67 = vector.shape_cast %64 : vector<2x128xf32> to vector<1x1x2x128xf32>
    tpu.vector_store %arg5[%c0_70, %c1_71, %c0_72, %c0_73], %67 {strides = array<i32>} : memref<2x3x2x128xf32, #tpu.memory_space<vmem>>, vector<1x1x2x128xf32>,
    %c0_74 = arith.constant 0 : index
    %c0_75 = arith.constant 0 : index
    %c0_76 = arith.constant 0 : index
    %c0_77 = arith.constant 0 : index
    %68 = vector.load %arg2[%c0_74, %c0_75, %c0_76, %c0_77] : memref<2x4x2x128xf32, #tpu.memory_space<vmem>>, vector<1x1x2x128xf32>
    %69 = vector.shape_cast %68 : vector<1x1x2x128xf32> to vector<2x128xf32>
    %c2_78 = arith.constant 2 : index
    %c0_79 = arith.constant 0 : index
    %c0_80 = arith.constant 0 : index
    %c0_81 = arith.constant 0 : index
    %70 = vector.load %arg3[%c2_78, %c0_79, %c0_80, %c0_81] : memref<3x4x1x128xf32, #tpu.memory_space<vmem>>, vector<1x1x1x128xf32>
    %71 = vector.shape_cast %70 : vector<1x1x1x128xf32> to vector<1x128xf32>
    %72 = vector.broadcast %71 : vector<1x128xf32> to vector<2x128xf32>
    %73 = arith.mulf %69, %72 : vector<2x128xf32>
    %c0_82 = arith.constant 0 : index
    %c1_83 = arith.constant 1 : index
    %c0_84 = arith.constant 0 : index
    %c0_85 = arith.constant 0 : index
    %74 = vector.load %arg2[%c0_82, %c1_83, %c0_84, %c0_85] : memref<2x4x2x128xf32, #tpu.memory_space<vmem>>, vector<1x1x2x128xf32>
    %75 = vector.shape_cast %74 : vector<1x1x2x128xf32> to vector<2x128xf32>
    %c2_86 = arith.constant 2 : index
    %c1_87 = arith.constant 1 : index
    %c0_88 = arith.constant 0 : index
    %c0_89 = arith.constant 0 : index
    %76 = vector.load %arg3[%c2_86, %c1_87, %c0_88, %c0_89] : memref<3x4x1x128xf32, #tpu.memory_space<vmem>>, vector<1x1x1x128xf32>
    %77 = vector.shape_cast %76 : vector<1x1x1x128xf32> to vector<1x128xf32>
    %78 = vector.broadcast %77 : vector<1x128xf32> to vector<2x128xf32>
    %79 = arith.mulf %75, %78 : vector<2x128xf32>
    %80 = arith.addf %73, %79 : vector<2x128xf32>
    %c0_90 = arith.constant 0 : index
    %c2_91 = arith.constant 2 : index
    %c0_92 = arith.constant 0 : index
    %c0_93 = arith.constant 0 : index
    %81 = vector.load %arg2[%c0_90, %c2_91, %c0_92, %c0_93] : memref<2x4x2x128xf32, #tpu.memory_space<vmem>>, vector<1x1x2x128xf32>
    %82 = vector.shape_cast %81 : vector<1x1x2x128xf32> to vector<2x128xf32>
    %c2_94 = arith.constant 2 : index
    %c2_95 = arith.constant 2 : index
    %c0_96 = arith.constant 0 : index
    %c0_97 = arith.constant 0 : index
    %83 = vector.load %arg3[%c2_94, %c2_95, %c0_96, %c0_97] : memref<3x4x1x128xf32, #tpu.memory_space<vmem>>, vector<1x1x1x128xf32>
    %84 = vector.shape_cast %83 : vector<1x1x1x128xf32> to vector<1x128xf32>
    %85 = vector.broadcast %84 : vector<1x128xf32> to vector<2x128xf32>
    %86 = arith.mulf %82, %85 : vector<2x128xf32>
    %87 = arith.addf %80, %86 : vector<2x128xf32>
    %c0_98 = arith.constant 0 : index
    %c3_99 = arith.constant 3 : index
    %c0_100 = arith.constant 0 : index
    %c0_101 = arith.constant 0 : index
    %88 = vector.load %arg2[%c0_98, %c3_99, %c0_100, %c0_101] : memref<2x4x2x128xf32, #tpu.memory_space<vmem>>, vector<1x1x2x128xf32>
    %89 = vector.shape_cast %88 : vector<1x1x2x128xf32> to vector<2x128xf32>
    %c2_102 = arith.constant 2 : index
    %c3_103 = arith.constant 3 : index
    %c0_104 = arith.constant 0 : index
    %c0_105 = arith.constant 0 : index
    %90 = vector.load %arg3[%c2_102, %c3_103, %c0_104, %c0_105] : memref<3x4x1x128xf32, #tpu.memory_space<vmem>>, vector<1x1x1x128xf32>
    %91 = vector.shape_cast %90 : vector<1x1x1x128xf32> to vector<1x128xf32>
    %92 = vector.broadcast %91 : vector<1x128xf32> to vector<2x128xf32>
    %93 = arith.mulf %89, %92 : vector<2x128xf32>
    %94 = arith.addf %87, %93 : vector<2x128xf32>
    %c2_106 = arith.constant 2 : index
    %c0_107 = arith.constant 0 : index
    %c0_108 = arith.constant 0 : index
    %95 = vector.load %arg4[%c2_106, %c0_107, %c0_108] : memref<3x1x128xf32, #tpu.memory_space<vmem>>, vector<1x1x128xf32>
    %96 = vector.shape_cast %95 : vector<1x1x128xf32> to vector<1x128xf32>
    %97 = vector.broadcast %96 : vector<1x128xf32> to vector<2x128xf32>
    %98 = arith.addf %94, %97 : vector<2x128xf32>
    %c0_109 = arith.constant 0 : index
    %c2_110 = arith.constant 2 : index
    %c0_111 = arith.constant 0 : index
    %c0_112 = arith.constant 0 : index
    %99 = vector.load %arg5[%c0_109, %c2_110, %c0_111, %c0_112] : memref<2x3x2x128xf32, #tpu.memory_space<vmem>>, vector<1x1x2x128xf32>
    %100 = vector.shape_cast %99 : vector<1x1x2x128xf32> to vector<2x128xf32>
    %101 = vector.shape_cast %98 : vector<2x128xf32> to vector<1x1x2x128xf32>
    tpu.vector_store %arg5[%c0_109, %c2_110, %c0_111, %c0_112], %101 {strides = array<i32>} : memref<2x3x2x128xf32, #tpu.memory_space<vmem>>, vector<1x1x2x128xf32>,
    %c1_113 = arith.constant 1 : index
    %c0_114 = arith.constant 0 : index
    %c0_115 = arith.constant 0 : index
    %c0_116 = arith.constant 0 : index
    %102 = vector.load %arg2[%c1_113, %c0_114, %c0_115, %c0_116] : memref<2x4x2x128xf32, #tpu.memory_space<vmem>>, vector<1x1x2x128xf32>
    %103 = vector.shape_cast %102 : vector<1x1x2x128xf32> to vector<2x128xf32>
    %c0_117 = arith.constant 0 : index
    %c0_118 = arith.constant 0 : index
    %c0_119 = arith.constant 0 : index
    %c0_120 = arith.constant 0 : index
    %104 = vector.load %arg3[%c0_117, %c0_118, %c0_119, %c0_120] : memref<3x4x1x128xf32, #tpu.memory_space<vmem>>, vector<1x1x1x128xf32>
    %105 = vector.shape_cast %104 : vector<1x1x1x128xf32> to vector<1x128xf32>
    %106 = vector.broadcast %105 : vector<1x128xf32> to vector<2x128xf32>
    %107 = arith.mulf %103, %106 : vector<2x128xf32>
    %c1_121 = arith.constant 1 : index
    %c1_122 = arith.constant 1 : index
    %c0_123 = arith.constant 0 : index
    %c0_124 = arith.constant 0 : index
    %108 = vector.load %arg2[%c1_121, %c1_122, %c0_123, %c0_124] : memref<2x4x2x128xf32, #tpu.memory_space<vmem>>, vector<1x1x2x128xf32>
    %109 = vector.shape_cast %108 : vector<1x1x2x128xf32> to vector<2x128xf32>
    %c0_125 = arith.constant 0 : index
    %c1_126 = arith.constant 1 : index
    %c0_127 = arith.constant 0 : index
    %c0_128 = arith.constant 0 : index
    %110 = vector.load %arg3[%c0_125, %c1_126, %c0_127, %c0_128] : memref<3x4x1x128xf32, #tpu.memory_space<vmem>>, vector<1x1x1x128xf32>
    %111 = vector.shape_cast %110 : vector<1x1x1x128xf32> to vector<1x128xf32>
    %112 = vector.broadcast %111 : vector<1x128xf32> to vector<2x128xf32>
    %113 = arith.mulf %109, %112 : vector<2x128xf32>
    %114 = arith.addf %107, %113 : vector<2x128xf32>
    %c1_129 = arith.constant 1 : index
    %c2_130 = arith.constant 2 : index
    %c0_131 = arith.constant 0 : index
    %c0_132 = arith.constant 0 : index
    %115 = vector.load %arg2[%c1_129, %c2_130, %c0_131, %c0_132] : memref<2x4x2x128xf32, #tpu.memory_space<vmem>>, vector<1x1x2x128xf32>
    %116 = vector.shape_cast %115 : vector<1x1x2x128xf32> to vector<2x128xf32>
    %c0_133 = arith.constant 0 : index
    %c2_134 = arith.constant 2 : index
    %c0_135 = arith.constant 0 : index
    %c0_136 = arith.constant 0 : index
    %117 = vector.load %arg3[%c0_133, %c2_134, %c0_135, %c0_136] : memref<3x4x1x128xf32, #tpu.memory_space<vmem>>, vector<1x1x1x128xf32>
    %118 = vector.shape_cast %117 : vector<1x1x1x128xf32> to vector<1x128xf32>
    %119 = vector.broadcast %118 : vector<1x128xf32> to vector<2x128xf32>
    %120 = arith.mulf %116, %119 : vector<2x128xf32>
    %121 = arith.addf %114, %120 : vector<2x128xf32>
    %c1_137 = arith.constant 1 : index
    %c3_138 = arith.constant 3 : index
    %c0_139 = arith.constant 0 : index
    %c0_140 = arith.constant 0 : index
    %122 = vector.load %arg2[%c1_137, %c3_138, %c0_139, %c0_140] : memref<2x4x2x128xf32, #tpu.memory_space<vmem>>, vector<1x1x2x128xf32>
    %123 = vector.shape_cast %122 : vector<1x1x2x128xf32> to vector<2x128xf32>
    %c0_141 = arith.constant 0 : index
    %c3_142 = arith.constant 3 : index
    %c0_143 = arith.constant 0 : index
    %c0_144 = arith.constant 0 : index
    %124 = vector.load %arg3[%c0_141, %c3_142, %c0_143, %c0_144] : memref<3x4x1x128xf32, #tpu.memory_space<vmem>>, vector<1x1x1x128xf32>
    %125 = vector.shape_cast %124 : vector<1x1x1x128xf32> to vector<1x128xf32>
    %126 = vector.broadcast %125 : vector<1x128xf32> to vector<2x128xf32>
    %127 = arith.mulf %123, %126 : vector<2x128xf32>
    %128 = arith.addf %121, %127 : vector<2x128xf32>
    %c0_145 = arith.constant 0 : index
    %c0_146 = arith.constant 0 : index
    %c0_147 = arith.constant 0 : index
    %129 = vector.load %arg4[%c0_145, %c0_146, %c0_147] : memref<3x1x128xf32, #tpu.memory_space<vmem>>, vector<1x1x128xf32>
    %130 = vector.shape_cast %129 : vector<1x1x128xf32> to vector<1x128xf32>
    %131 = vector.broadcast %130 : vector<1x128xf32> to vector<2x128xf32>
    %132 = arith.addf %128, %131 : vector<2x128xf32>
    %c1_148 = arith.constant 1 : index
    %c0_149 = arith.constant 0 : index
    %c0_150 = arith.constant 0 : index
    %c0_151 = arith.constant 0 : index
    %133 = vector.load %arg5[%c1_148, %c0_149, %c0_150, %c0_151] : memref<2x3x2x128xf32, #tpu.memory_space<vmem>>, vector<1x1x2x128xf32>
    %134 = vector.shape_cast %133 : vector<1x1x2x128xf32> to vector<2x128xf32>
    %135 = vector.shape_cast %132 : vector<2x128xf32> to vector<1x1x2x128xf32>
    tpu.vector_store %arg5[%c1_148, %c0_149, %c0_150, %c0_151], %135 {strides = array<i32>} : memref<2x3x2x128xf32, #tpu.memory_space<vmem>>, vector<1x1x2x128xf32>,
    %c1_152 = arith.constant 1 : index
    %c0_153 = arith.constant 0 : index
    %c0_154 = arith.constant 0 : index
    %c0_155 = arith.constant 0 : index
    %136 = vector.load %arg2[%c1_152, %c0_153, %c0_154, %c0_155] : memref<2x4x2x128xf32, #tpu.memory_space<vmem>>, vector<1x1x2x128xf32>
    %137 = vector.shape_cast %136 : vector<1x1x2x128xf32> to vector<2x128xf32>
    %c1_156 = arith.constant 1 : index
    %c0_157 = arith.constant 0 : index
    %c0_158 = arith.constant 0 : index
    %c0_159 = arith.constant 0 : index
    %138 = vector.load %arg3[%c1_156, %c0_157, %c0_158, %c0_159] : memref<3x4x1x128xf32, #tpu.memory_space<vmem>>, vector<1x1x1x128xf32>
    %139 = vector.shape_cast %138 : vector<1x1x1x128xf32> to vector<1x128xf32>
    %140 = vector.broadcast %139 : vector<1x128xf32> to vector<2x128xf32>
    %141 = arith.mulf %137, %140 : vector<2x128xf32>
    %c1_160 = arith.constant 1 : index
    %c1_161 = arith.constant 1 : index
    %c0_162 = arith.constant 0 : index
    %c0_163 = arith.constant 0 : index
    %142 = vector.load %arg2[%c1_160, %c1_161, %c0_162, %c0_163] : memref<2x4x2x128xf32, #tpu.memory_space<vmem>>, vector<1x1x2x128xf32>
    %143 = vector.shape_cast %142 : vector<1x1x2x128xf32> to vector<2x128xf32>
    %c1_164 = arith.constant 1 : index
    %c1_165 = arith.constant 1 : index
    %c0_166 = arith.constant 0 : index
    %c0_167 = arith.constant 0 : index
    %144 = vector.load %arg3[%c1_164, %c1_165, %c0_166, %c0_167] : memref<3x4x1x128xf32, #tpu.memory_space<vmem>>, vector<1x1x1x128xf32>
    %145 = vector.shape_cast %144 : vector<1x1x1x128xf32> to vector<1x128xf32>
    %146 = vector.broadcast %145 : vector<1x128xf32> to vector<2x128xf32>
    %147 = arith.mulf %143, %146 : vector<2x128xf32>
    %148 = arith.addf %141, %147 : vector<2x128xf32>
    %c1_168 = arith.constant 1 : index
    %c2_169 = arith.constant 2 : index
    %c0_170 = arith.constant 0 : index
    %c0_171 = arith.constant 0 : index
    %149 = vector.load %arg2[%c1_168, %c2_169, %c0_170, %c0_171] : memref<2x4x2x128xf32, #tpu.memory_space<vmem>>, vector<1x1x2x128xf32>
    %150 = vector.shape_cast %149 : vector<1x1x2x128xf32> to vector<2x128xf32>
    %c1_172 = arith.constant 1 : index
    %c2_173 = arith.constant 2 : index
    %c0_174 = arith.constant 0 : index
    %c0_175 = arith.constant 0 : index
    %151 = vector.load %arg3[%c1_172, %c2_173, %c0_174, %c0_175] : memref<3x4x1x128xf32, #tpu.memory_space<vmem>>, vector<1x1x1x128xf32>
    %152 = vector.shape_cast %151 : vector<1x1x1x128xf32> to vector<1x128xf32>
    %153 = vector.broadcast %152 : vector<1x128xf32> to vector<2x128xf32>
    %154 = arith.mulf %150, %153 : vector<2x128xf32>
    %155 = arith.addf %148, %154 : vector<2x128xf32>
    %c1_176 = arith.constant 1 : index
    %c3_177 = arith.constant 3 : index
    %c0_178 = arith.constant 0 : index
    %c0_179 = arith.constant 0 : index
    %156 = vector.load %arg2[%c1_176, %c3_177, %c0_178, %c0_179] : memref<2x4x2x128xf32, #tpu.memory_space<vmem>>, vector<1x1x2x128xf32>
    %157 = vector.shape_cast %156 : vector<1x1x2x128xf32> to vector<2x128xf32>
    %c1_180 = arith.constant 1 : index
    %c3_181 = arith.constant 3 : index
    %c0_182 = arith.constant 0 : index
    %c0_183 = arith.constant 0 : index
    %158 = vector.load %arg3[%c1_180, %c3_181, %c0_182, %c0_183] : memref<3x4x1x128xf32, #tpu.memory_space<vmem>>, vector<1x1x1x128xf32>
    %159 = vector.shape_cast %158 : vector<1x1x1x128xf32> to vector<1x128xf32>
    %160 = vector.broadcast %159 : vector<1x128xf32> to vector<2x128xf32>
    %161 = arith.mulf %157, %160 : vector<2x128xf32>
    %162 = arith.addf %155, %161 : vector<2x128xf32>
    %c1_184 = arith.constant 1 : index
    %c0_185 = arith.constant 0 : index
    %c0_186 = arith.constant 0 : index
    %163 = vector.load %arg4[%c1_184, %c0_185, %c0_186] : memref<3x1x128xf32, #tpu.memory_space<vmem>>, vector<1x1x128xf32>
    %164 = vector.shape_cast %163 : vector<1x1x128xf32> to vector<1x128xf32>
    %165 = vector.broadcast %164 : vector<1x128xf32> to vector<2x128xf32>
    %166 = arith.addf %162, %165 : vector<2x128xf32>
    %c1_187 = arith.constant 1 : index
    %c1_188 = arith.constant 1 : index
    %c0_189 = arith.constant 0 : index
    %c0_190 = arith.constant 0 : index
    %167 = vector.load %arg5[%c1_187, %c1_188, %c0_189, %c0_190] : memref<2x3x2x128xf32, #tpu.memory_space<vmem>>, vector<1x1x2x128xf32>
    %168 = vector.shape_cast %167 : vector<1x1x2x128xf32> to vector<2x128xf32>
    %169 = vector.shape_cast %166 : vector<2x128xf32> to vector<1x1x2x128xf32>
    tpu.vector_store %arg5[%c1_187, %c1_188, %c0_189, %c0_190], %169 {strides = array<i32>} : memref<2x3x2x128xf32, #tpu.memory_space<vmem>>, vector<1x1x2x128xf32>,
    %c1_191 = arith.constant 1 : index
    %c0_192 = arith.constant 0 : index
    %c0_193 = arith.constant 0 : index
    %c0_194 = arith.constant 0 : index
    %170 = vector.load %arg2[%c1_191, %c0_192, %c0_193, %c0_194] : memref<2x4x2x128xf32, #tpu.memory_space<vmem>>, vector<1x1x2x128xf32>
    %171 = vector.shape_cast %170 : vector<1x1x2x128xf32> to vector<2x128xf32>
    %c2_195 = arith.constant 2 : index
    %c0_196 = arith.constant 0 : index
    %c0_197 = arith.constant 0 : index
    %c0_198 = arith.constant 0 : index
    %172 = vector.load %arg3[%c2_195, %c0_196, %c0_197, %c0_198] : memref<3x4x1x128xf32, #tpu.memory_space<vmem>>, vector<1x1x1x128xf32>
    %173 = vector.shape_cast %172 : vector<1x1x1x128xf32> to vector<1x128xf32>
    %174 = vector.broadcast %173 : vector<1x128xf32> to vector<2x128xf32>
    %175 = arith.mulf %171, %174 : vector<2x128xf32>
    %c1_199 = arith.constant 1 : index
    %c1_200 = arith.constant 1 : index
    %c0_201 = arith.constant 0 : index
    %c0_202 = arith.constant 0 : index
    %176 = vector.load %arg2[%c1_199, %c1_200, %c0_201, %c0_202] : memref<2x4x2x128xf32, #tpu.memory_space<vmem>>, vector<1x1x2x128xf32>
    %177 = vector.shape_cast %176 : vector<1x1x2x128xf32> to vector<2x128xf32>
    %c2_203 = arith.constant 2 : index
    %c1_204 = arith.constant 1 : index
    %c0_205 = arith.constant 0 : index
    %c0_206 = arith.constant 0 : index
    %178 = vector.load %arg3[%c2_203, %c1_204, %c0_205, %c0_206] : memref<3x4x1x128xf32, #tpu.memory_space<vmem>>, vector<1x1x1x128xf32>
    %179 = vector.shape_cast %178 : vector<1x1x1x128xf32> to vector<1x128xf32>
    %180 = vector.broadcast %179 : vector<1x128xf32> to vector<2x128xf32>
    %181 = arith.mulf %177, %180 : vector<2x128xf32>
    %182 = arith.addf %175, %181 : vector<2x128xf32>
    %c1_207 = arith.constant 1 : index
    %c2_208 = arith.constant 2 : index
    %c0_209 = arith.constant 0 : index
    %c0_210 = arith.constant 0 : index
    %183 = vector.load %arg2[%c1_207, %c2_208, %c0_209, %c0_210] : memref<2x4x2x128xf32, #tpu.memory_space<vmem>>, vector<1x1x2x128xf32>
    %184 = vector.shape_cast %183 : vector<1x1x2x128xf32> to vector<2x128xf32>
    %c2_211 = arith.constant 2 : index
    %c2_212 = arith.constant 2 : index
    %c0_213 = arith.constant 0 : index
    %c0_214 = arith.constant 0 : index
    %185 = vector.load %arg3[%c2_211, %c2_212, %c0_213, %c0_214] : memref<3x4x1x128xf32, #tpu.memory_space<vmem>>, vector<1x1x1x128xf32>
    %186 = vector.shape_cast %185 : vector<1x1x1x128xf32> to vector<1x128xf32>
    %187 = vector.broadcast %186 : vector<1x128xf32> to vector<2x128xf32>
    %188 = arith.mulf %184, %187 : vector<2x128xf32>
    %189 = arith.addf %182, %188 : vector<2x128xf32>
    %c1_215 = arith.constant 1 : index
    %c3_216 = arith.constant 3 : index
    %c0_217 = arith.constant 0 : index
    %c0_218 = arith.constant 0 : index
    %190 = vector.load %arg2[%c1_215, %c3_216, %c0_217, %c0_218] : memref<2x4x2x128xf32, #tpu.memory_space<vmem>>, vector<1x1x2x128xf32>
    %191 = vector.shape_cast %190 : vector<1x1x2x128xf32> to vector<2x128xf32>
    %c2_219 = arith.constant 2 : index
    %c3_220 = arith.constant 3 : index
    %c0_221 = arith.constant 0 : index
    %c0_222 = arith.constant 0 : index
    %192 = vector.load %arg3[%c2_219, %c3_220, %c0_221, %c0_222] : memref<3x4x1x128xf32, #tpu.memory_space<vmem>>, vector<1x1x1x128xf32>
    %193 = vector.shape_cast %192 : vector<1x1x1x128xf32> to vector<1x128xf32>
    %194 = vector.broadcast %193 : vector<1x128xf32> to vector<2x128xf32>
    %195 = arith.mulf %191, %194 : vector<2x128xf32>
    %196 = arith.addf %189, %195 : vector<2x128xf32>
    %c2_223 = arith.constant 2 : index
    %c0_224 = arith.constant 0 : index
    %c0_225 = arith.constant 0 : index
    %197 = vector.load %arg4[%c2_223, %c0_224, %c0_225] : memref<3x1x128xf32, #tpu.memory_space<vmem>>, vector<1x1x128xf32>
    %198 = vector.shape_cast %197 : vector<1x1x128xf32> to vector<1x128xf32>
    %199 = vector.broadcast %198 : vector<1x128xf32> to vector<2x128xf32>
    %200 = arith.addf %196, %199 : vector<2x128xf32>
    %c1_226 = arith.constant 1 : index
    %c2_227 = arith.constant 2 : index
    %c0_228 = arith.constant 0 : index
    %c0_229 = arith.constant 0 : index
    %201 = vector.load %arg5[%c1_226, %c2_227, %c0_228, %c0_229] : memref<2x3x2x128xf32, #tpu.memory_space<vmem>>, vector<1x1x2x128xf32>
    %202 = vector.shape_cast %201 : vector<1x1x2x128xf32> to vector<2x128xf32>
    %203 = vector.shape_cast %200 : vector<2x128xf32> to vector<1x1x2x128xf32>
    tpu.vector_store %arg5[%c1_226, %c2_227, %c0_228, %c0_229], %203 {strides = array<i32>} : memref<2x3x2x128xf32, #tpu.memory_space<vmem>>, vector<1x1x2x128xf32>,
    return
  }
  func.func @transform_0(%arg0: i32, %arg1: i32) -> (i32, i32, i32, i32) {
    %c0_i32 = arith.constant 0 : i32
    %c0_i32_0 = arith.constant 0 : i32
    %c0_i32_1 = arith.constant 0 : i32
    return %arg0, %c0_i32, %arg1, %c0_i32_0 : i32, i32, i32, i32
  }
  func.func @transform_1(%arg0: i32, %arg1: i32) -> (i32, i32, i32, i32) {
    %c0_i32 = arith.constant 0 : i32
    %c0_i32_0 = arith.constant 0 : i32
    %c0_i32_1 = arith.constant 0 : i32
    %c0_i32_2 = arith.constant 0 : i32
    %c0_i32_3 = arith.constant 0 : i32
    return %c0_i32, %c0_i32_0, %c0_i32_1, %c0_i32_2 : i32, i32, i32, i32
  }
  func.func @transform_2(%arg0: i32, %arg1: i32) -> (i32, i32, i32) {
    %c0_i32 = arith.constant 0 : i32
    %c0_i32_0 = arith.constant 0 : i32
    %c0_i32_1 = arith.constant 0 : i32
    %c0_i32_2 = arith.constant 0 : i32
    return %c0_i32, %c0_i32_0, %c0_i32_1 : i32, i32, i32
  }
  func.func @transform_3(%arg0: i32, %arg1: i32) -> (i32, i32, i32, i32) {
    %c0_i32 = arith.constant 0 : i32
    %c0_i32_0 = arith.constant 0 : i32
    %c0_i32_1 = arith.constant 0 : i32
    return %arg0, %c0_i32, %arg1, %c0_i32_0 : i32, i32, i32, i32
  }
}

</mosaic_0001>

<bundles_post_ra>
// kernel: tpu_custom_call.1
= control target key start
LH: loop header
LB: loop body
LE: loop exit
PB: predicated region body
PF: predicated region fallthrough
CT: control target
= control target key end

     0   :  { %8 = vsyncpa [#allocation3], 0  ;;  %s569_s0 = inlined_call_operand.hbm [shape: f32[2,4,2,128], index: 0, kind: input, shape index: {}]   ;;  %s570_s1 = inlined_call_operand.hbm [shape: f32[3,4,1,128], index: 1, kind: input, shape index: {}]   ;;  %s571_s2 = inlined_call_operand.vmem [shape: f32[3,1,128], index: 2, kind: input, shape index: {}]   ;;  %s572_s3 = inlined_call_operand.hbm [shape: f32[2,3,2,128], index: 3, kind: output, shape index: {}]  }
   0x1   :  { %9 = vsyncpa [#allocation6], 0 }
   0x2   :  { %10 = vsyncpa [#allocation4], 0  ;;  %s487_s12 = smov [#allocation2]   ;;  %s415_s16 = scalar_lea.hbm %s569_s0, 256 }
   0x3   :  { %s16_s13 = sshll.u32 %s487_s12, 4  ;;  %p416_p0 = scmp.ne.s32.totalorder %s569_s0, %s415_s16  ;;  %s17_s13 = int_to_ptr.vmem [resolvable:$true] %s16_s13 }
   0x4   :  { %p419_p1 = scmp.lt.u32.totalorder %s415_s16, %s569_s0 }
   0x6   :  { %p421_p2 = pnand %p419_p1, %p416_p0 }
   0x8   :  { %424 = shalt.err (!%p421_p2)
}
   0x9   :  { %s425_s21 = scalar_lea.vmem %s17_s13, 256  ;;  %p430_p4 = scmp.lt.s32.totalorder %s17_s13, %s17_s13 }
   0xa   :  { %p426_p3 = scmp.ne.s32.totalorder %s17_s13, %s425_s21  ;;  %p431_p5 = scmp.lt.s32.totalorder %s425_s21, %s425_s21 }
   0xc   :  { %p432_p6 = por %p431_p5, %p430_p4 }
   0xe   :  { %p433_p7 = pnand %p432_p6, %p426_p3 }
  0x10   :  { %436 = shalt.err (!%p433_p7)
}
  0x11   :  { %s488_s22 = smov 32   ;;  %s489_s23 = smov 2  }
  0x12   :  { %22 = dma.hbm_to_vmem [thread:$0]  %s569_s0, 256, %s17_s13, [#allocation3], %s488_s22, %s488_s22, %s489_s23  }
  0x13   :  { %s490_s26 = smov [#allocation5]   ;;  %s437_s30 = scalar_lea.hbm %s570_s1, 192 }
  0x14   :  { %s28_s27 = sshll.u32 %s490_s26, 4  ;;  %p438_p8 = scmp.ne.s32.totalorder %s570_s1, %s437_s30  ;;  %s29_s27 = int_to_ptr.vmem [resolvable:$true] %s28_s27 }
  0x15   :  { %p441_p9 = scmp.lt.u32.totalorder %s437_s30, %s570_s1 }
  0x17   :  { %p443_p10 = pnand %p441_p9, %p438_p8 }
  0x19   :  { %446 = shalt.err (!%p443_p10)
}
  0x1a   :  { %s447_s8 = scalar_lea.vmem %s29_s27, 192  ;;  %p452_p12 = scmp.lt.s32.totalorder %s29_s27, %s29_s27 }
  0x1b   :  { %p448_p11 = scmp.ne.s32.totalorder %s29_s27, %s447_s8  ;;  %p453_p13 = scmp.lt.s32.totalorder %s447_s8, %s447_s8 }
  0x1d   :  { %p454_p0 = por %p453_p13, %p452_p12 }
  0x1f   :  { %p455_p1 = pnand %p454_p0, %p448_p11 }
  0x21   :  { %458 = shalt.err (!%p455_p1)
}
  0x22   :  { %s491_s0 = smov 16   ;;  %s492_s9 = smov 1  }
  0x23   :  { %34 = dma.hbm_to_vmem [thread:$0]  %s570_s1, 192, %s29_s27, [#allocation6], %s491_s0, %s491_s0, %s492_s9  }
  0x24   :  { %481 = dma.done.wait [#allocation3], 256  }
  0x25   :  { %482 = vsyncadd [#allocation3], 4294967040 }
  0x26   :  { %483 = dma.done.wait [#allocation6], 192  }
  0x27   :  { %484 = vsyncadd [#allocation6], 4294967104  ;;  %v43_v0 = vld [vmem:[#allocation2] sm:$0x3]  ;;  %v374_v1 = vld [vmem:[#allocation5] ss:$0 sm:$0xff] }
  0x28   :  { %v53_v2 = vld [vmem:[#allocation2 + $0x2] sm:$0x3]  ;;  %v51_v3 = vmul.f32 %v374_v1, %v43_v0  ;;  %v375_v4 = vld [vmem:[#allocation5 + $0x1] ss:$0 sm:$0xff]  ;;  %v65_v5 = vld [vmem:[#allocation2 + $0x4] sm:$0x3] }
  0x29   :  { %v376_v6 = vld [vmem:[#allocation5 + $0x2] ss:$0 sm:$0xff]  ;;  %v62_v7 = vmul.f32 %v375_v4, %v53_v2  ;;  %v77_v9 = vld [vmem:[#allocation2 + $0x6] sm:$0x3]  ;;  %v377_v10 = vld [vmem:[#allocation5 + $0x3] ss:$0 sm:$0xff] }
  0x2a   :  { %v74_v8 = vmul.f32 %v376_v6, %v65_v5  ;;  %v97_v11 = vld [vmem:[#allocation2] sm:$0x3]  ;;  %v379_v12 = vld [vmem:[#allocation5 + $0x4] ss:$0 sm:$0xff]  ;;  %v107_v13 = vld [vmem:[#allocation2 + $0x2] sm:$0x3]  ;;  %v86_v15 = vmul.f32 %v377_v10, %v77_v9 }
  0x2b   :  { %v63_v14 = vadd.f32 %v62_v7, %v51_v3  ;;  %v106_v16 = vmul.f32 %v379_v12, %v97_v11  ;;  %v380_v17 = vld [vmem:[#allocation5 + $0x5] ss:$0 sm:$0xff]  ;;  %v118_v18 = vld [vmem:[#allocation2 + $0x4] sm:$0x3]  ;;  %v381_v19 = vld [vmem:[#allocation5 + $0x6] ss:$0 sm:$0xff] }
  0x2c   :  { %v544_v20 = vld [vmem:[%s571_s2] ss:$0 sm:$0xff]  ;;  %v116_v21 = vmul.f32 %v380_v17, %v107_v13  ;;  %v127_v22 = vmul.f32 %v381_v19, %v118_v18  ;;  %v129_v23 = vld [vmem:[#allocation2 + $0x6] sm:$0x3]  ;;  %v382_v24 = vld [vmem:[#allocation5 + $0x7] ss:$0 sm:$0xff] }
  0x2d   :  { %v75_v25 = vadd.f32 %v74_v8, %v63_v14  ;;  %v151_v26 = vld [vmem:[#allocation2] sm:$0x3]  ;;  %v385_v27 = vld [vmem:[#allocation5 + $0x8] ss:$0 sm:$0xff]  ;;  %v161_v28 = vld [vmem:[#allocation2 + $0x2] sm:$0x3]  ;;  %v138_v30 = vmul.f32 %v382_v24, %v129_v23 }
  0x2e   :  { %v117_v29 = vadd.f32 %v116_v21, %v106_v16  ;;  %v160_v31 = vmul.f32 %v385_v27, %v151_v26  ;;  %v386_v32 = vld [vmem:[#allocation5 + $0x9] ss:$0 sm:$0xff]  ;;  %v172_v33 = vld [vmem:[#allocation2 + $0x4] sm:$0x3]  ;;  %v387_v34 = vld [vmem:[#allocation5 + $0xa] ss:$0 sm:$0xff] }
  0x2f   :  { %v87_v35 = vadd.f32 %v86_v15, %v75_v25  ;;  %v384_v36 = vld [vmem:[%s571_s2 + $0x1] ss:$0 sm:$0xff]  ;;  %v170_v37 = vmul.f32 %v386_v32, %v161_v28  ;;  %v181_v38 = vmul.f32 %v387_v34, %v172_v33  ;;  %v183_v39 = vld [vmem:[#allocation2 + $0x6] sm:$0x3]  ;;  %v388_v40 = vld [vmem:[#allocation5 + $0xb] ss:$0 sm:$0xff] }
  0x30   :  { %v128_v41 = vadd.f32 %v127_v22, %v117_v29  ;;  %v192_v42 = vmul.f32 %v388_v40, %v183_v39  ;;  %v206_v43 = vld [vmem:[#allocation2 + $0x8] sm:$0x3]  ;;  %v216_v44 = vld [vmem:[#allocation2 + $0xa] sm:$0x3]  ;;  %v227_v45 = vld [vmem:[#allocation2 + $0xc] sm:$0x3] }
  0x31   :  { %v95_v46 = vadd.f32 %v544_v20, %v87_v35  ;;  %v171_v47 = vadd.f32 %v170_v37, %v160_v31  ;;  %v214_v48 = vmul.f32 %v374_v1, %v206_v43  ;;  %v224_v49 = vmul.f32 %v375_v4, %v216_v44  ;;  %v238_v50 = vld [vmem:[#allocation2 + $0xe] sm:$0x3]  ;;  %v258_v51 = vld [vmem:[#allocation2 + $0x8] sm:$0x3]  ;;  %v267_v52 = vld [vmem:[#allocation2 + $0xa] sm:$0x3] }
  0x32   :  { %v139_v53 = vadd.f32 %v138_v30, %v128_v41  ;;  %v235_v54 = vmul.f32 %v376_v6, %v227_v45  ;;  %v246_v55 = vmul.f32 %v377_v10, %v238_v50  ;;  %v266_v56 = vmul.f32 %v379_v12, %v258_v51  ;;  %v277_v57 = vld [vmem:[#allocation2 + $0xc] sm:$0x3]  ;;  %v287_v58 = vld [vmem:[#allocation2 + $0xe] sm:$0x3]  ;;  %v307_v59 = vld [vmem:[#allocation2 + $0x8] sm:$0x3] }
  0x33   :  { %96 = vst [vmem:[#allocation7] sm:$0x3] %v95_v46  ;;  %v182_v60 = vadd.f32 %v181_v38, %v171_v47  ;;  %v225_v61 = vadd.f32 %v224_v49, %v214_v48  ;;  %v275_v62 = vmul.f32 %v380_v17, %v267_v52  ;;  %v285_v63 = vmul.f32 %v381_v19, %v277_v57  ;;  %v316_v0 = vld [vmem:[#allocation2 + $0xa] sm:$0x3]  ;;  %v326_v2 = vld [vmem:[#allocation2 + $0xc] sm:$0x3] }
  0x34   :  { %v336_v3 = vld [vmem:[#allocation2 + $0xe] sm:$0x3]  ;;  %v148_v1 = vadd.f32 %v384_v36, %v139_v53  ;;  %v390_v4 = vld [vmem:[%s571_s2 + $0x2] ss:$0 sm:$0xff]  ;;  %v295_v5 = vmul.f32 %v382_v24, %v287_v58  ;;  %v315_v6 = vmul.f32 %v385_v27, %v307_v59  ;;  %v324_v7 = vmul.f32 %v386_v32, %v316_v0  ;;  %s493_s17 = smov [#allocation7]  }
  0x35   :  { %v193_v8 = vadd.f32 %v192_v42, %v182_v60  ;;  %v236_v9 = vadd.f32 %v235_v54, %v225_v61  ;;  %v276_v10 = vadd.f32 %v275_v62, %v266_v56  ;;  %v334_v11 = vmul.f32 %v387_v34, %v326_v2  ;;  %s361_s2 = sshll.u32 %s493_s17, 4  ;;  %s362_s2 = int_to_ptr.vmem [resolvable:$true] %s361_s2 }
  0x36   :  { %150 = vst [vmem:[#allocation7 + $0x2] sm:$0x3] %v148_v1  ;;  %v325_v12 = vadd.f32 %v324_v7, %v315_v6  ;;  %v344_v13 = vmul.f32 %v388_v40, %v336_v3  ;;  %s459_s18 = scalar_lea.vmem %s362_s2, 192  ;;  %p464_p3 = scmp.lt.s32.totalorder %s362_s2, %s362_s2 }
  0x37   :  { %v202_v14 = vadd.f32 %v390_v4, %v193_v8  ;;  %v247_v15 = vadd.f32 %v246_v55, %v236_v9  ;;  %v286_v16 = vadd.f32 %v285_v63, %v276_v10  ;;  %p460_p2 = scmp.ne.s32.totalorder %s362_s2, %s459_s18  ;;  %p465_p4 = scmp.lt.s32.totalorder %s459_s18, %s459_s18 }
  0x38   :  { %v335_v17 = vadd.f32 %v334_v11, %v325_v12 }
  0x39   :  { %204 = vst [vmem:[#allocation7 + $0x4] sm:$0x3] %v202_v14  ;;  %v255_v18 = vadd.f32 %v544_v20, %v247_v15  ;;  %v296_v19 = vadd.f32 %v295_v5, %v286_v16  ;;  %p466_p5 = por %p465_p4, %p464_p3 }
  0x3a   :  { %v345_v21 = vadd.f32 %v344_v13, %v335_v17 }
  0x3b   :  { %257 = vst [vmem:[#allocation7 + $0x6] sm:$0x3] %v255_v18  ;;  %v304_v22 = vadd.f32 %v384_v36, %v296_v19  ;;  %p467_p6 = pnand %p466_p5, %p460_p2 }
  0x3c   :  { %v353_v23 = vadd.f32 %v390_v4, %v345_v21 }
  0x3d   :  { %306 = vst [vmem:[#allocation7 + $0x8] sm:$0x3] %v304_v22 }
  0x3e   :  { %355 = vst [vmem:[#allocation7 + $0xa] sm:$0x3] %v353_v23 }
  0x3f   :  { %470 = shalt.err (!%p467_p6)
}
  0x40   :  { %s471_s21 = scalar_lea.hbm %s572_s3, 192 }
  0x41   :  { %p472_p7 = scmp.ne.s32.totalorder %s572_s3, %s471_s21  ;;  %p475_p8 = scmp.lt.u32.totalorder %s471_s21, %s572_s3 }
  0x43   :  { %p477_p9 = pnand %p475_p8, %p472_p7 }
  0x45   :  { %480 = shalt.err (!%p477_p9)
}
  0x46   :  { %367 = dma.vmem_to_hbm [thread:$0]  %s362_s2, 192, %s572_s3, [#allocation4], %s488_s22, %s488_s22, %s489_s23  }
  0x47   :  { %485 = dma.done.wait [#allocation4], 192  }
  0x48   :  { %486 = vsyncadd [#allocation4], 4294967104 }
  0x49   :  { %371 = vsyncpa [#allocation3], 1 }
  0x4a   :  { %372 = vsyncpa [#allocation6], 1 }
  0x4b   :  { %373 = vsyncpa [#allocation4], 1 }

</bundles_post_ra>
